<compile_context>
chip_gen: v7x
topology: tpu7x:2x2x1
jax: 0.10.0
libtpu: 0.0.40
codegen_flags: <defaults>
</compile_context>

<pallas_src>
import functools

import jax
import jax.numpy as jnp
from jax.experimental import pallas as pl
from jax.experimental.pallas import tpu as pltpu

LANE = 128


def _round_up(x, m):
    return (x + m - 1) // m * m


# ---------------------------------------------------------------------------
# Kernel
# ---------------------------------------------------------------------------
def _lstm_seq_kernel(in_pad, h_pad,
                     x_ref, h0_ref, c0_ref, wcat_ref, bcat_ref, wlin_ref,
                     blin_ref,
                     y_ref, hT_ref, cT_ref,
                     xh_ref, h_ref, c_ref):
    """grid=(T,): one LSTM step + linear head per grid iteration.

    Weights (wcat/bcat/wlin/blin) are VMEM-resident (constant index_map);
    h_ref/c_ref scratch carry the recurrent state across grid steps.
    """
    t = pl.program_id(0)

    @pl.when(t == 0)
    def _():
        h_ref[...] = h0_ref[...]
        c_ref[...] = c0_ref[...]

    # Build xh = [x_t (padded) | h_{t-1} (padded)] with lane-aligned stores.
    xh_ref[:, :in_pad] = x_ref[0]          # lanes [0, in_pad)
    xh_ref[:, in_pad:] = h_ref[...]        # lanes [in_pad, in_pad + h_pad)

    # Single fused gate matmul: (1, in_pad+h_pad) @ (in_pad+h_pad, 4*h_pad).
    gates = (jnp.dot(xh_ref[...], wcat_ref[...],
                     preferred_element_type=jnp.float32)
             + bcat_ref[...])

    # 128-lane-aligned gate slices (PyTorch order i, f, g, o).
    i = jax.nn.sigmoid(gates[:, 0 * h_pad:1 * h_pad])
    f = jax.nn.sigmoid(gates[:, 1 * h_pad:2 * h_pad])
    g = jnp.tanh(gates[:, 2 * h_pad:3 * h_pad])
    o = jax.nn.sigmoid(gates[:, 3 * h_pad:4 * h_pad])

    c_new = f * c_ref[...] + i * g
    h_new = o * jnp.tanh(c_new)
    c_ref[...] = c_new
    h_ref[...] = h_new

    # Linear head: lane-dense (1, OUT_PAD) output per step.
    y = (jnp.dot(h_new, wlin_ref[...], preferred_element_type=jnp.float32)
         + blin_ref[...])
    y_ref[0] = y

    # Final-state outputs are resident (constant index_map) -> single HBM
    # writeback at the end of the grid.
    hT_ref[...] = h_new
    cT_ref[...] = c_new


# ---------------------------------------------------------------------------
# Wrappers
# ---------------------------------------------------------------------------
def lstm_sequence(xs, h0, c0, p):
    """Runs T successive forward() steps in a single pallas_call.

    xs: (T, inputs); h0/c0: (1, hidden).
    Returns (ys (T, outputs), (h_T (1, hidden), c_T (1, hidden))).
    """
    T = xs.shape[0]
    inputs, outputs, hidden = p["inputs"], p["outputs"], p["hidden"]
    in_pad, h_pad, out_pad = p["IN_PAD"], p["H_PAD"], p["OUT_PAD"]

    x_padded = (jnp.zeros((T, 1, in_pad), jnp.float32)
                .at[:, 0, :inputs].set(xs.astype(jnp.float32)))
    h0_padded = (jnp.zeros((1, h_pad), jnp.float32)
                 .at[:, :hidden].set(h0.astype(jnp.float32)))
    c0_padded = (jnp.zeros((1, h_pad), jnp.float32)
                 .at[:, :hidden].set(c0.astype(jnp.float32)))

    kernel = functools.partial(_lstm_seq_kernel, in_pad, h_pad)

    y_padded, hT, cT = pl.pallas_call(
        kernel,
        out_shape=(
            jax.ShapeDtypeStruct((T, 1, out_pad), jnp.float32),
            jax.ShapeDtypeStruct((1, h_pad), jnp.float32),
            jax.ShapeDtypeStruct((1, h_pad), jnp.float32),
        ),
        grid_spec=pltpu.PrefetchScalarGridSpec(
            num_scalar_prefetch=0,
            grid=(T,),
            in_specs=[
                pl.BlockSpec((1, 1, in_pad), lambda t: (t, 0, 0)),        # x_t
                pl.BlockSpec((1, h_pad), lambda t: (0, 0)),               # h0
                pl.BlockSpec((1, h_pad), lambda t: (0, 0)),               # c0
                pl.BlockSpec((in_pad + h_pad, 4 * h_pad),
                             lambda t: (0, 0)),                           # W_cat
                pl.BlockSpec((1, 4 * h_pad), lambda t: (0, 0)),           # b_cat
                pl.BlockSpec((h_pad, out_pad), lambda t: (0, 0)),         # W_lin
                pl.BlockSpec((1, out_pad), lambda t: (0, 0)),             # b_lin
            ],
            out_specs=(
                pl.BlockSpec((1, 1, out_pad), lambda t: (t, 0, 0)),       # y_t
                pl.BlockSpec((1, h_pad), lambda t: (0, 0)),               # h_T
                pl.BlockSpec((1, h_pad), lambda t: (0, 0)),               # c_T
            ),
            scratch_shapes=[
                pltpu.VMEM((1, in_pad + h_pad), jnp.float32),  # xh
                pltpu.VMEM((1, h_pad), jnp.float32),           # h carry
                pltpu.VMEM((1, h_pad), jnp.float32),           # c carry
            ],
        ),
        compiler_params=pltpu.CompilerParams(
            dimension_semantics=("arbitrary",)),
    )(x_padded, h0_padded, c0_padded,
      p["W_cat"], p["b_cat"], p["W_lin"], p["b_lin"])

    ys = y_padded[:, 0, :outputs]
    return ys, (hT[:, :hidden], cT[:, :hidden])


def lstm_forward(x_vec, h_t, c_t, p):
    """Mirrors LSTM.forward: one step. Returns (y (1, outputs), (h, c))."""
    # torch.reshape(inputs, (1, inputs.size(0))) -> a length-1 sequence.
    y, (h_new, c_new) = lstm_sequence(x_vec.reshape(1, -1), h_t, c_t, p)
    return y, (h_new, c_new)


# ---------------------------------------------------------------------------
# Parameters
# ---------------------------------------------------------------------------
def init_raw_params(key, inputs, outputs, hidden):
    """PyTorch-shaped parameters, U(-1/sqrt(H), 1/sqrt(H)) init."""
    ks = jax.random.split(key, 6)
    bound = 1.0 / jnp.sqrt(jnp.float32(hidden))
    u = lambda k, shape: jax.random.uniform(k, shape, jnp.float32, -bound, bound)
    return {
        "W_ih": u(ks[0], (4 * hidden, inputs)),   # weight_ih_l0
        "W_hh": u(ks[1], (4 * hidden, hidden)),   # weight_hh_l0
        "b_ih": u(ks[2], (4 * hidden,)),
        "b_hh": u(ks[3], (4 * hidden,)),
        "W_lin": u(ks[4], (outputs, hidden)),     # lin_layer.weight
        "b_lin": u(ks[5], (outputs,)),
    }


def pack_params(raw, inputs, outputs, hidden):
    """Pack / pad weights into the lane-aligned layout the kernel uses."""
    in_pad = _round_up(inputs, LANE)
    h_pad = _round_up(hidden, LANE)
    out_pad = _round_up(outputs, LANE)

    W_ih, W_hh = raw["W_ih"], raw["W_hh"]
    b = raw["b_ih"] + raw["b_hh"]

    W_cat = jnp.zeros((in_pad + h_pad, 4 * h_pad), jnp.float32)
    b_cat = jnp.zeros((1, 4 * h_pad), jnp.float32)
    for k in range(4):  # gate order [i, f, g, o]
        W_cat = W_cat.at[:inputs, k * h_pad:k * h_pad + hidden].set(
            W_ih[k * hidden:(k + 1) * hidden, :].T)
        W_cat = W_cat.at[in_pad:in_pad + hidden,
                         k * h_pad:k * h_pad + hidden].set(
            W_hh[k * hidden:(k + 1) * hidden, :].T)
        b_cat = b_cat.at[0, k * h_pad:k * h_pad + hidden].set(
            b[k * hidden:(k + 1) * hidden])

    W_lin = (jnp.zeros((h_pad, out_pad), jnp.float32)
             .at[:hidden, :outputs].set(raw["W_lin"].T))
    b_lin = (jnp.zeros((1, out_pad), jnp.float32)
             .at[0, :outputs].set(raw["b_lin"]))

    return {
        "W_cat": W_cat, "b_cat": b_cat, "W_lin": W_lin, "b_lin": b_lin,
        "inputs": inputs, "outputs": outputs, "hidden": hidden,
        "IN_PAD": in_pad, "H_PAD": h_pad, "OUT_PAD": out_pad,
    }


# ---------------------------------------------------------------------------
# Pure-JAX reference
# ---------------------------------------------------------------------------
def _reference_sequence(xs, h, c, raw, hidden):
    hp = jax.lax.Precision.HIGHEST
    b = (raw["b_ih"] + raw["b_hh"]).reshape(1, -1)
    ys = []
    for t in range(xs.shape[0]):
        x = xs[t:t + 1]
        gates = (jnp.dot(x, raw["W_ih"].T, precision=hp)
                 + jnp.dot(h, raw["W_hh"].T, precision=hp) + b)
        i = jax.nn.sigmoid(gates[:, 0 * hidden:1 * hidden])
        f = jax.nn.sigmoid(gates[:, 1 * hidden:2 * hidden])
        g = jnp.tanh(gates[:, 2 * hidden:3 * hidden])
        o = jax.nn.sigmoid(gates[:, 3 * hidden:4 * hidden])
        c = f * c + i * g
        h = o * jnp.tanh(c)
        ys.append(jnp.dot(h, raw["W_lin"].T, precision=hp)
                  + raw["b_lin"].reshape(1, -1))
    return jnp.concatenate(ys, axis=0), h, c


# ---------------------------------------------------------------------------
if __name__ == "__main__":
    INPUTS, OUTPUTS, HIDDEN, SEQ = 16, 8, 32, 8

    key = jax.random.PRNGKey(0)
    k_param, k_x = jax.random.split(key)

    raw = init_raw_params(k_param, INPUTS, OUTPUTS, HIDDEN)
    packed = pack_params(raw, INPUTS, OUTPUTS, HIDDEN)

    xs = jax.random.normal(k_x, (SEQ, INPUTS), jnp.float32)
    h0 = jnp.zeros((1, HIDDEN), jnp.float32)  # self.h_t
    c0 = jnp.zeros((1, HIDDEN), jnp.float32)  # self.c_t

    # (a) Whole sequence fused in ONE pallas_call (the perf-optimized path).
    ys, (hT, cT) = lstm_sequence(xs, h0, c0, packed)

    # (b) Step-by-step, exactly mirroring repeated PyTorch forward() calls.
    h, c = h0, c0
    ys_step = []
    for t in range(SEQ):
        y, (h, c) = lstm_forward(xs[t], h, c, packed)
        ys_step.append(y)
    ys_step = jnp.concatenate(ys_step, axis=0)

    jax.block_until_ready((ys, hT, cT, ys_step, h, c))

    # Pure-JAX reference.
    y_ref, h_ref, c_ref = _reference_sequence(xs, h0, c0, raw, HIDDEN)

    assert ys.shape == (SEQ, OUTPUTS)
    assert hT.shape == (1, HIDDEN) and cT.shape == (1, HIDDEN)
    assert jnp.allclose(ys, y_ref, atol=1e-4), "fused sequence mismatch"
    assert jnp.allclose(hT, h_ref, atol=1e-4), "h_T mismatch"
    assert jnp.allclose(cT, c_ref, atol=1e-4), "c_T mismatch"
    assert jnp.allclose(ys_step, y_ref, atol=1e-4), "per-step mismatch"
    assert jnp.allclose(h, h_ref, atol=1e-4) and jnp.allclose(c, c_ref, atol=1e-4)
    assert jnp.allclose(ys_step, ys, atol=1e-5), "per-step vs fused mismatch"

    print("KERNEL_OK")
</pallas_src>

<mosaic_0001>
module attributes {stable_mosaic.version = 11 : i64} {
  func.func @_lstm_seq_kernel(%arg0: i32, %arg1: memref<1x1x128xf32, #tpu.memory_space<vmem>>, %arg2: memref<1x128xf32, #tpu.memory_space<vmem>>, %arg3: memref<1x128xf32, #tpu.memory_space<vmem>>, %arg4: memref<256x512xf32, #tpu.memory_space<vmem>>, %arg5: memref<1x512xf32, #tpu.memory_space<vmem>>, %arg6: memref<128x128xf32, #tpu.memory_space<vmem>>, %arg7: memref<1x128xf32, #tpu.memory_space<vmem>>, %arg8: memref<1x1x128xf32, #tpu.memory_space<vmem>>, %arg9: memref<1x128xf32, #tpu.memory_space<vmem>>, %arg10: memref<1x128xf32, #tpu.memory_space<vmem>>, %arg11: memref<1x256xf32, #tpu.memory_space<vmem>>, %arg12: memref<1x128xf32, #tpu.memory_space<vmem>>, %arg13: memref<1x128xf32, #tpu.memory_space<vmem>>) attributes {dimension_semantics = [#tpu.dimension_semantics<arbitrary>], iteration_bounds = array<i64: 8>, scalar_prefetch = 0 : i64, scratch_operands = 3 : i64, tpu.core_type = #tpu.core_type<tc>, window_params = [{transform_indices = @transform_0, window_bounds = array<i64: 1, 1, 128>}, {pipeline_mode = #tpu.pipeline_mode<synchronous>, transform_indices = @transform_1, window_bounds = array<i64: 1, 128>}, {pipeline_mode = #tpu.pipeline_mode<synchronous>, transform_indices = @transform_2, window_bounds = array<i64: 1, 128>}, {pipeline_mode = #tpu.pipeline_mode<synchronous>, transform_indices = @transform_3, window_bounds = array<i64: 256, 512>}, {pipeline_mode = #tpu.pipeline_mode<synchronous>, transform_indices = @transform_4, window_bounds = array<i64: 1, 512>}, {pipeline_mode = #tpu.pipeline_mode<synchronous>, transform_indices = @transform_5, window_bounds = array<i64: 128, 128>}, {pipeline_mode = #tpu.pipeline_mode<synchronous>, transform_indices = @transform_6, window_bounds = array<i64: 1, 128>}, {transform_indices = @transform_7, window_bounds = array<i64: 1, 1, 128>}, {pipeline_mode = #tpu.pipeline_mode<synchronous>, transform_indices = @transform_8, window_bounds = array<i64: 1, 128>}, {pipeline_mode = #tpu.pipeline_mode<synchronous>, transform_indices = @transform_9, window_bounds = array<i64: 1, 128>}]} {
    %c0_i32 = arith.constant 0 : i32
    %0 = arith.cmpi eq, %arg0, %c0_i32 : i32
    %1 = arith.extui %0 : i1 to i32
    %c0_i32_0 = arith.constant 0 : i32
    %2 = arith.cmpi ne, %1, %c0_i32_0 : i32
    scf.if %2 {
      %c0_35 = arith.constant 0 : index
      %c0_36 = arith.constant 0 : index
      %50 = vector.load %arg2[%c0_35, %c0_36] : memref<1x128xf32, #tpu.memory_space<vmem>>, vector<1x128xf32>
      %c0_37 = arith.constant 0 : index
      %c0_38 = arith.constant 0 : index
      %51 = vector.load %arg12[%c0_37, %c0_38] : memref<1x128xf32, #tpu.memory_space<vmem>>, vector<1x128xf32>
      tpu.vector_store %arg12[%c0_37, %c0_38], %50 {strides = array<i32>} : memref<1x128xf32, #tpu.memory_space<vmem>>, vector<1x128xf32>,
      %c0_39 = arith.constant 0 : index
      %c0_40 = arith.constant 0 : index
      %52 = vector.load %arg3[%c0_39, %c0_40] : memref<1x128xf32, #tpu.memory_space<vmem>>, vector<1x128xf32>
      %c0_41 = arith.constant 0 : index
      %c0_42 = arith.constant 0 : index
      %53 = vector.load %arg13[%c0_41, %c0_42] : memref<1x128xf32, #tpu.memory_space<vmem>>, vector<1x128xf32>
      tpu.vector_store %arg13[%c0_41, %c0_42], %52 {strides = array<i32>} : memref<1x128xf32, #tpu.memory_space<vmem>>, vector<1x128xf32>,
    } else {
    }
    %c0 = arith.constant 0 : index
    %c0_1 = arith.constant 0 : index
    %c0_2 = arith.constant 0 : index
    %3 = vector.load %arg1[%c0, %c0_1, %c0_2] : memref<1x1x128xf32, #tpu.memory_space<vmem>>, vector<1x1x128xf32>
    %4 = vector.shape_cast %3 : vector<1x1x128xf32> to vector<1x128xf32>
    %c0_3 = arith.constant 0 : index
    %c0_4 = arith.constant 0 : index
    %5 = vector.load %arg11[%c0_3, %c0_4] : memref<1x256xf32, #tpu.memory_space<vmem>>, vector<1x128xf32>
    tpu.vector_store %arg11[%c0_3, %c0_4], %4 {strides = array<i32>} : memref<1x256xf32, #tpu.memory_space<vmem>>, vector<1x128xf32>,
    %c0_5 = arith.constant 0 : index
    %c0_6 = arith.constant 0 : index
    %6 = vector.load %arg12[%c0_5, %c0_6] : memref<1x128xf32, #tpu.memory_space<vmem>>, vector<1x128xf32>
    %c0_7 = arith.constant 0 : index
    %c128 = arith.constant 128 : index
    %7 = vector.load %arg11[%c0_7, %c128] : memref<1x256xf32, #tpu.memory_space<vmem>>, vector<1x128xf32>
    tpu.vector_store %arg11[%c0_7, %c128], %6 {strides = array<i32>} : memref<1x256xf32, #tpu.memory_space<vmem>>, vector<1x128xf32>,
    %c0_8 = arith.constant 0 : index
    %c0_9 = arith.constant 0 : index
    %8 = vector.load %arg11[%c0_8, %c0_9] : memref<1x256xf32, #tpu.memory_space<vmem>>, vector<1x256xf32>
    %c0_10 = arith.constant 0 : index
    %c0_11 = arith.constant 0 : index
    %9 = vector.load %arg4[%c0_10, %c0_11] : memref<256x512xf32, #tpu.memory_space<vmem>>, vector<256x512xf32>
    %cst = arith.constant dense<0.000000e+00> : vector<1x512xf32>
    %10 = tpu.matmul %8, %9, %cst {dimension_numbers = #tpu.dot_dimension_numbers<[1], [0], [0], [1], [0, 0, 1, 1], [], []>} : vector<1x256xf32>, vector<256x512xf32>, vector<1x512xf32> -> vector<1x512xf32>
    %c0_12 = arith.constant 0 : index
    %c0_13 = arith.constant 0 : index
    %11 = vector.load %arg5[%c0_12, %c0_13] : memref<1x512xf32, #tpu.memory_space<vmem>>, vector<1x512xf32>
    %12 = arith.addf %10, %11 : vector<1x512xf32>
    %13 = vector.extract_strided_slice %12 {offsets = [0, 0], sizes = [1, 128], strides = [1, 1]} : vector<1x512xf32> to vector<1x128xf32>
    %14 = arith.negf %13 : vector<1x128xf32>
    %15 = math.exp %14 : vector<1x128xf32>
    %cst_14 = arith.constant 1.000000e+00 : f32
    %16 = vector.broadcast %cst_14 : f32 to vector<1x128xf32>
    %17 = arith.addf %16, %15 : vector<1x128xf32>
    %18 = arith.divf %16, %17 : vector<1x128xf32>
    %19 = vector.extract_strided_slice %12 {offsets = [0, 128], sizes = [1, 128], strides = [1, 1]} : vector<1x512xf32> to vector<1x128xf32>
    %20 = arith.negf %19 : vector<1x128xf32>
    %21 = math.exp %20 : vector<1x128xf32>
    %cst_15 = arith.constant 1.000000e+00 : f32
    %22 = vector.broadcast %cst_15 : f32 to vector<1x128xf32>
    %23 = arith.addf %22, %21 : vector<1x128xf32>
    %24 = arith.divf %22, %23 : vector<1x128xf32>
    %25 = vector.extract_strided_slice %12 {offsets = [0, 256], sizes = [1, 128], strides = [1, 1]} : vector<1x512xf32> to vector<1x128xf32>
    %26 = math.tanh %25 : vector<1x128xf32>
    %27 = vector.extract_strided_slice %12 {offsets = [0, 384], sizes = [1, 128], strides = [1, 1]} : vector<1x512xf32> to vector<1x128xf32>
    %28 = arith.negf %27 : vector<1x128xf32>
    %29 = math.exp %28 : vector<1x128xf32>
    %cst_16 = arith.constant 1.000000e+00 : f32
    %30 = vector.broadcast %cst_16 : f32 to vector<1x128xf32>
    %31 = arith.addf %30, %29 : vector<1x128xf32>
    %32 = arith.divf %30, %31 : vector<1x128xf32>
    %c0_17 = arith.constant 0 : index
    %c0_18 = arith.constant 0 : index
    %33 = vector.load %arg13[%c0_17, %c0_18] : memref<1x128xf32, #tpu.memory_space<vmem>>, vector<1x128xf32>
    %34 = arith.mulf %24, %33 : vector<1x128xf32>
    %35 = arith.mulf %18, %26 : vector<1x128xf32>
    %36 = arith.addf %34, %35 : vector<1x128xf32>
    %37 = math.tanh %36 : vector<1x128xf32>
    %38 = arith.mulf %32, %37 : vector<1x128xf32>
    %c0_19 = arith.constant 0 : index
    %c0_20 = arith.constant 0 : index
    %39 = vector.load %arg13[%c0_19, %c0_20] : memref<1x128xf32, #tpu.memory_space<vmem>>, vector<1x128xf32>
    tpu.vector_store %arg13[%c0_19, %c0_20], %36 {strides = array<i32>} : memref<1x128xf32, #tpu.memory_space<vmem>>, vector<1x128xf32>,
    %c0_21 = arith.constant 0 : index
    %c0_22 = arith.constant 0 : index
    %40 = vector.load %arg12[%c0_21, %c0_22] : memref<1x128xf32, #tpu.memory_space<vmem>>, vector<1x128xf32>
    tpu.vector_store %arg12[%c0_21, %c0_22], %38 {strides = array<i32>} : memref<1x128xf32, #tpu.memory_space<vmem>>, vector<1x128xf32>,
    %c0_23 = arith.constant 0 : index
    %c0_24 = arith.constant 0 : index
    %41 = vector.load %arg6[%c0_23, %c0_24] : memref<128x128xf32, #tpu.memory_space<vmem>>, vector<128x128xf32>
    %cst_25 = arith.constant dense<0.000000e+00> : vector<1x128xf32>
    %42 = tpu.matmul %38, %41, %cst_25 {dimension_numbers = #tpu.dot_dimension_numbers<[1], [0], [0], [1], [0, 0, 1, 1], [], []>} : vector<1x128xf32>, vector<128x128xf32>, vector<1x128xf32> -> vector<1x128xf32>
    %c0_26 = arith.constant 0 : index
    %c0_27 = arith.constant 0 : index
    %43 = vector.load %arg7[%c0_26, %c0_27] : memref<1x128xf32, #tpu.memory_space<vmem>>, vector<1x128xf32>
    %44 = arith.addf %42, %43 : vector<1x128xf32>
    %c0_28 = arith.constant 0 : index
    %c0_29 = arith.constant 0 : index
    %c0_30 = arith.constant 0 : index
    %45 = vector.load %arg8[%c0_28, %c0_29, %c0_30] : memref<1x1x128xf32, #tpu.memory_space<vmem>>, vector<1x1x128xf32>
    %46 = vector.shape_cast %45 : vector<1x1x128xf32> to vector<1x128xf32>
    %47 = vector.shape_cast %44 : vector<1x128xf32> to vector<1x1x128xf32>
    tpu.vector_store %arg8[%c0_28, %c0_29, %c0_30], %47 {strides = array<i32>} : memref<1x1x128xf32, #tpu.memory_space<vmem>>, vector<1x1x128xf32>,
    %c0_31 = arith.constant 0 : index
    %c0_32 = arith.constant 0 : index
    %48 = vector.load %arg9[%c0_31, %c0_32] : memref<1x128xf32, #tpu.memory_space<vmem>>, vector<1x128xf32>
    tpu.vector_store %arg9[%c0_31, %c0_32], %38 {strides = array<i32>} : memref<1x128xf32, #tpu.memory_space<vmem>>, vector<1x128xf32>,
    %c0_33 = arith.constant 0 : index
    %c0_34 = arith.constant 0 : index
    %49 = vector.load %arg10[%c0_33, %c0_34] : memref<1x128xf32, #tpu.memory_space<vmem>>, vector<1x128xf32>
    tpu.vector_store %arg10[%c0_33, %c0_34], %36 {strides = array<i32>} : memref<1x128xf32, #tpu.memory_space<vmem>>, vector<1x128xf32>,
    return
  }
  func.func @transform_0(%arg0: i32) -> (i32, i32, i32) {
    %c0_i32 = arith.constant 0 : i32
    %c0_i32_0 = arith.constant 0 : i32
    %c0_i32_1 = arith.constant 0 : i32
    return %arg0, %c0_i32, %c0_i32_0 : i32, i32, i32
  }
  func.func @transform_1(%arg0: i32) -> (i32, i32) {
    %c0_i32 = arith.constant 0 : i32
    %c0_i32_0 = arith.constant 0 : i32
    %c0_i32_1 = arith.constant 0 : i32
    return %c0_i32, %c0_i32_0 : i32, i32
  }
  func.func @transform_2(%arg0: i32) -> (i32, i32) {
    %c0_i32 = arith.constant 0 : i32
    %c0_i32_0 = arith.constant 0 : i32
    %c0_i32_1 = arith.constant 0 : i32
    return %c0_i32, %c0_i32_0 : i32, i32
  }
  func.func @transform_3(%arg0: i32) -> (i32, i32) {
    %c0_i32 = arith.constant 0 : i32
    %c0_i32_0 = arith.constant 0 : i32
    %c0_i32_1 = arith.constant 0 : i32
    return %c0_i32, %c0_i32_0 : i32, i32
  }
  func.func @transform_4(%arg0: i32) -> (i32, i32) {
    %c0_i32 = arith.constant 0 : i32
    %c0_i32_0 = arith.constant 0 : i32
    %c0_i32_1 = arith.constant 0 : i32
    return %c0_i32, %c0_i32_0 : i32, i32
  }
  func.func @transform_5(%arg0: i32) -> (i32, i32) {
    %c0_i32 = arith.constant 0 : i32
    %c0_i32_0 = arith.constant 0 : i32
    %c0_i32_1 = arith.constant 0 : i32
    return %c0_i32, %c0_i32_0 : i32, i32
  }
  func.func @transform_6(%arg0: i32) -> (i32, i32) {
    %c0_i32 = arith.constant 0 : i32
    %c0_i32_0 = arith.constant 0 : i32
    %c0_i32_1 = arith.constant 0 : i32
    return %c0_i32, %c0_i32_0 : i32, i32
  }
  func.func @transform_7(%arg0: i32) -> (i32, i32, i32) {
    %c0_i32 = arith.constant 0 : i32
    %c0_i32_0 = arith.constant 0 : i32
    %c0_i32_1 = arith.constant 0 : i32
    return %arg0, %c0_i32, %c0_i32_0 : i32, i32, i32
  }
  func.func @transform_8(%arg0: i32) -> (i32, i32) {
    %c0_i32 = arith.constant 0 : i32
    %c0_i32_0 = arith.constant 0 : i32
    %c0_i32_1 = arith.constant 0 : i32
    return %c0_i32, %c0_i32_0 : i32, i32
  }
  func.func @transform_9(%arg0: i32) -> (i32, i32) {
    %c0_i32 = arith.constant 0 : i32
    %c0_i32_0 = arith.constant 0 : i32
    %c0_i32_1 = arith.constant 0 : i32
    return %c0_i32, %c0_i32_0 : i32, i32
  }
}

</mosaic_0001>

<bundles_post_ra>
// kernel: tpu_custom_call.1
= control target key start
LH: loop header
LB: loop body
LE: loop exit
PB: predicated region body
PF: predicated region fallthrough
CT: control target
= control target key end

     0   :  { %15 = vsyncpa [#allocation6], 0  ;;  %s1853_s0 = inlined_call_operand.hbm [shape: f32[8,1,128], index: 0, kind: input, shape index: {}]   ;;  %s1854_s1 = inlined_call_operand.vmem [shape: f32[1,128], index: 1, kind: input, shape index: {}]   ;;  %s1855_s2 = inlined_call_operand.vmem [shape: f32[1,128], index: 2, kind: input, shape index: {}]   ;;  %s1856_s3 = inlined_call_operand.hbm [shape: f32[256,512], index: 3, kind: input, shape index: {}]   ;;  %s1857_s4 = inlined_call_operand.vmem [shape: f32[1,512], index: 4, kind: input, shape index: {}]   ;;  %s1858_s5 = inlined_call_operand.hbm [shape: f32[128,128], index: 5, kind: input, shape index: {}]   ;;  %s1859_s6 = inlined_call_operand.vmem [shape: f32[1,128], index: 6, kind: input, shape index: {}]   ;;  %s1860_s7 = inlined_call_operand.hbm [shape: f32[8,1,128], index: 7, kind: output, shape index: {0}]   ;;  %s1861_s8 = inlined_call_operand.hbm [shape: f32[1,128], index: 8, kind: output, shape index: {1}]   ;;  %s1862_s9 = inlined_call_operand.hbm [shape: f32[1,128], index: 9, kind: output, shape index: {2}]  }
   0x1   :  { %17 = vsyncpa [#allocation6 + $0x1], 0 }
   0x2   :  { %18 = vsyncpa [#allocation9], 0 }
   0x3   :  { %19 = vsyncpa [#allocation7], 0 }
   0x4   :  { %21 = vsyncpa [#allocation7 + $0x1], 0 }
   0x5   :  { %22 = vsyncpa [#allocation13], 0  ;;  %s1549_s30 = smov 0   ;;  %s1551_s10 = smov 0  }
   0x6   :  { %s1553_s11 = smov 0   ;;  %s1555_s12 = smov 0  }
   0x7 LB: > { %s1570_s13 = sadd.s32 4294967295, %s1484_s12   ;;  %s944_s14 = sadd.s32 4294967294, %s1484_s12   ;;  %s1484_s12 = sphi %s1555_s12, %s1895_s12   ;;  %s1480_s11 = sphi %s1553_s11, %s1894_s11   ;;  %s1476_s10 = sphi %s1551_s10, %s1893_s10   ;;  %s1472_s30 = sphi %s1549_s30, %s1892_s30  }
   0x8   : > { %p48_p0 = scmp.ne.s32.totalorder %s1476_s10, %s1472_s30  ;;  %p1863_p1 = scmp.eq.s32.totalorder %s1570_s13, 0 }
   0x9   : > { %p204_p3 = scmp.eq.s32.totalorder %s944_s14, 7  ;;  %p945_p5 = scmp.ge.s32.totalorder %s1484_s12, 1 }
   0xa   : > { %p1579_p4 = por %p1863_p1, %p48_p0  ;;  %p253_p7 = scmp.lt.s32.totalorder %s1484_s12, 9 }
   0xb   : > { %p1584_p6 = por %p204_p3, %p48_p0  ;;  %s1486_s18 = smov [#allocation8]  }
   0xc   : > { %s1867_s15 = scalar_select %p1579_p4, 1, 0 }
   0xd   : > { %s1868_s16 = scalar_select %p1584_p6, 1, 0 }
   0xe   : > { %p1590_p9 = pnand %p945_p5, %p253_p7  ;;  %s271_s19 = sshll.u32 %s1486_s18, 4  ;;  %s272_s19 = int_to_ptr.vmem [resolvable:$true] %s271_s19 }
   0xf   : > { %1869 = sst [smem:[#allocation19_spill]] %s1868_s16  ;;  %s1487_s21 = smov [#allocation10]  }
  0x10   : > { %s1870_s17 = scalar_select %p1590_p9, 1, 0 }
  0x11   : > { %p1188_p10 = pneg %p1590_p9  ;;  %s287_s22 = sshll.u32 %s1487_s21, 4  ;;  %s1602_s22 = int_to_ptr.vmem [resolvable:$true] %s287_s22 }
  0x12   : > { %s1272_s25 = scalar_lea.hbm %s1856_s3, 16384 }
  0x13   : > { %p1598_p11 = pnand %p1188_p10, %p1863_p1  ;;  %p1273_p12 = scmp.ne.s32.totalorder %s1856_s3, %s1272_s25 }
  0x14   : > { %p1279_p5 = scmp.lt.u32.totalorder %s1272_s25, %s1856_s3 }
  0x15   : > { %p1274_p13 = pneg %p1598_p11 }
  0x17   : > { %p1275_p0 = pnand %p1274_p13, %p1273_p12 }
  0x19   : > { %p1276_p3 = pneg %p1275_p0 }
  0x1b   : > { %p1281_p7 = pnand %p1279_p5, %p1276_p3 }
  0x1d   : > { %1284 = shalt.err (!%p1281_p7)
}
  0x1e   : > { %s1285_s14 = scalar_lea.vmem %s272_s19, 16384  ;;  %p1293_p2 = scmp.lt.s32.totalorder %s272_s19, %s272_s19 }
  0x1f   : > { %p1286_p10 = scmp.ne.s32.totalorder %s272_s19, %s1285_s14  ;;  %p1294_p6 = scmp.lt.s32.totalorder %s1285_s14, %s1285_s14 }
  0x21   : > { %p1288_p8 = pnand %p1286_p10, %p1274_p13  ;;  %p1295_p4 = por %p1294_p6, %p1293_p2 }
  0x23   : > { %p1289_p1 = pneg %p1288_p8 }
  0x25   : > { %p1296_p9 = pnand %p1295_p4, %p1289_p1 }
  0x27   : > { %1299 = shalt.err (!%p1296_p9)
}
  0x28   : > { %s1488_s18 = smov 512   ;;  %s1489_s21 = smov 32  }
  0x29   : > { %1191 = dma.hbm_to_vmem [thread:$0]  (!%p1598_p11), %s1856_s3, 16384, %s272_s19, [#allocation9], %s1488_s18, %s1488_s18, %s1489_s21  }
  0x2a   : > { %s1300_s27 = scalar_lea.hbm %s1858_s5, 2048 }
  0x2b   : > { %p1301_p8 = scmp.ne.s32.totalorder %s1858_s5, %s1300_s27  ;;  %p1307_p4 = scmp.lt.u32.totalorder %s1300_s27, %s1858_s5 }
  0x2d   : > { %p1303_p1 = pnand %p1301_p8, %p1274_p13 }
  0x2f   : > { %p1304_p2 = pneg %p1303_p1 }
  0x31   : > { %p1309_p6 = pnand %p1307_p4, %p1304_p2 }
  0x33   : > { %1312 = shalt.err (!%p1309_p6)
}
  0x34   : > { %s1313_s19 = scalar_lea.vmem %s1602_s22, 2048  ;;  %p1321_p3 = scmp.lt.s32.totalorder %s1602_s22, %s1602_s22 }
  0x35   : > { %p1314_p9 = scmp.ne.s32.totalorder %s1602_s22, %s1313_s19  ;;  %p1322_p5 = scmp.lt.s32.totalorder %s1313_s19, %s1313_s19 }
  0x37   : > { %p1316_p12 = pnand %p1314_p9, %p1274_p13  ;;  %p1323_p7 = por %p1322_p5, %p1321_p3 }
  0x39   : > { %p1317_p0 = pneg %p1316_p12 }
  0x3b   : > { %p1324_p10 = pnand %p1323_p7, %p1317_p0 }
  0x3d   : > { %1327 = shalt.err (!%p1324_p10)
}
  0x3e   : > { %s1490_s16 = smov 128   ;;  %s1491_s18 = smov 8  }
  0x3f   : > { %1194 = dma.hbm_to_vmem [thread:$0]  (!%p1598_p11), %s1858_s5, 2048, %s1602_s22, [#allocation9], %s1490_s16, %s1490_s16, %s1491_s18  }
  0x40   : > { %s1652_s24 = sadd.s32 1, %s1484_s12   ;;  %s35_s26 = sadd.s32 1, %s1480_s11 }
  0x41   : > { %s32_s25 = ssub.s32 %s1484_s12, %s1652_s24  ;;  %p42_p8 = scmp.ne.s32.totalorder %s1480_s11, %s1476_s10 }
  0x42   : > { %p33_p13 = scmp.eq.s32.totalorder %s32_s25, 0  ;;  %p43_p1 = scmp.eq.s32.totalorder %s1484_s12, 0 }
  0x43   : > { %p1872_p4 = scmp.eq.s32.totalorder %s1570_s13, 7  ;;  %p1205_p9 = scmp.lt.s32.totalorder %s1484_s12, 8 }
  0x44   : > { %s1661_s27 = scalar_select %p33_p13, %s1480_s11, %s35_s26  }
  0x45   : > { %p44_p2 = por %p43_p1, %p42_p8  ;;  %p1665_p6 = por %p1872_p4, %p42_p8 }
  0x46   : > { %s304_s20 = sand.u32 1, %s1480_s11   ;;  %s949_s29 = sshll.u32 %s1484_s12, 4 }
  0x47   : > { %s307_s22 = scalar_lea.vmem [#allocation5], %s304_s20  ;;  %s1675_s18 = scalar_lea.hbm %s1853_s0, %s949_s29 }
  0x48   : > { %s314_s14 = sshll.u32 %s307_s22, 4  ;;  %p1679_p11 = pnand %p1205_p9, %p44_p2  ;;  %s1677_s14 = int_to_ptr.vmem [resolvable:$true] %s314_s14 }
  0x49   : > { %s305_s23 = scalar_lea.sflag [#allocation6], %s304_s20  ;;  %s1328_s25 = scalar_lea.hbm %s1675_s18, 16 }
  0x4a   : > { %p1329_p12 = scmp.ne.s32.totalorder %s1675_s18, %s1328_s25  ;;  %p1330_p0 = pneg %p1679_p11 }
  0x4b   : > { %s1333_s22 = scalar_lea.hbm %s1853_s0, 128  ;;  %p1334_p7 = scmp.lt.u32.totalorder %s1675_s18, %s1853_s0 }
  0x4c   : > { %p1331_p3 = pnand %p1330_p0, %p1329_p12  ;;  %p1335_p10 = scmp.lt.u32.totalorder %s1333_s22, %s1328_s25 }
  0x4d   : > { %p1337_p8 = scmp.lt.u32.totalorder %s1328_s25, %s1675_s18 }
  0x4e   : > { %p1332_p5 = pneg %p1331_p3  ;;  %p1336_p13 = por %p1335_p10, %p1334_p7 }
  0x50   : > { %p1338_p1 = por %p1337_p8, %p1336_p13 }
  0x52   : > { %p1339_p2 = pnand %p1338_p1, %p1332_p5 }
  0x54   : > { %1342 = shalt.err (!%p1339_p2)
}
  0x55   : > { %s1343_s20 = scalar_lea.vmem %s1677_s14, 16  ;;  %s1492_s26 = smov [#allocation5]  }
  0x56   : > { %p1344_p4 = scmp.ne.s32.totalorder %s1677_s14, %s1343_s20  ;;  %s1348_s29 = sshll.u32 %s1492_s26, 4  ;;  %s1349_s29 = int_to_ptr.vmem [resolvable:$false] %s1348_s29 }
  0x57   : > { %s1350_s19 = scalar_lea.vmem %s1349_s29, 32  ;;  %p1351_p3 = scmp.lt.s32.totalorder %s1677_s14, %s1349_s29 }
  0x58   : > { %p1346_p9 = pnand %p1344_p4, %p1330_p0  ;;  %p1352_p7 = scmp.lt.s32.totalorder %s1350_s19, %s1343_s20 }
  0x5a   : > { %p1347_p12 = pneg %p1346_p9  ;;  %p1353_p10 = por %p1352_p7, %p1351_p3 }
  0x5c   : > { %p1354_p13 = pnand %p1353_p10, %p1347_p12 }
  0x5e   : > { %1357 = shalt.err (!%p1354_p13)
}
  0x5f   : > { %1198 = dma.hbm_to_vmem [thread:$0]  (!%p1679_p11), %s1675_s18, 16, %s1677_s14, %s305_s23  }
  0x60   : > { %p1875_p5 = scmp.ne.s32.totalorder %s1870_s17, 0 }
  0x61   : > { %s1711_s25 = sand.u32 (!%p1875_p5), 1, %s1476_s10   ;;  %p1876_p0 = scmp.ne.s32.totalorder (!%p1875_p5), %s1867_s15, 0 }
  0x62   : > { %323 = sbr.rel (%p1875_p5) target bundleno = 677 (0x2a5), region = 48  ;;  %s326_s22 = scalar_lea.sflag (!%p1875_p5), [#allocation6], %s1711_s25 }
  0x63   : > { %s328_s16 = scalar_lea.vmem (!%p1875_p5), [#allocation5], %s1711_s25 }
  0x69   : > { %1455 = dma.done.wait (%p1876_p0), %s326_s22, 16  }
  0x6a   : > { %1457 = vsyncadd (%p1876_p0), %s326_s22, 4294967280  ;;  %p1877_p8 = scmp.eq.s32.totalorder %s1570_s13, 0 }
  0x6c   : > { %1459 = dma.done.wait (%p1877_p8), [#allocation9], 18432   ;;  %p1878_p11 = pmov %p1877_p8 }
  0x6d   : > { %s364_s17 = scalar_lea.vmem [#allocation11], %s1711_s25  ;;  %p1879_p1 = scmp.ne.s32.totalorder %s1570_s13, 0 }
  0x6e   : > { %1461 = vsyncadd (%p1878_p11), [#allocation9], 4294948864  ;;  %v373_v0 = vld [vmem:[%s1854_s1] sm:$0x1] (!%p1879_p1) }
  0x6f   : > { %372 = sbr.rel (%p1879_p1) target bundleno = 118 (0x76), region = 64  ;;  %v375_v1 = vld [vmem:[%s1855_s2] sm:$0x1] (!%p1879_p1)  ;;  %374 = vst [vmem:[#allocation3] sm:$0x1] (!%p1879_p1), %v373_v0 }
  0x70   : > { %376 = vst [vmem:[#allocation4] sm:$0x1] (!%p1879_p1), %v375_v1 }
  0x76 PF: > { %v387_v2 = vld [vmem:[#allocation8 + $0x8] sm:$0xff]  ;;  %v386_v4 = vld [vmem:[#allocation8] sm:$0xff]  ;;  %v389_v20 = vld [vmem:[#allocation8 + $0x18] sm:$0xff]  ;;  %vm1494_vm1 = vmmov 0   ;;  %s1496_s26 = smov [#allocation12]   ;;  %p1882_p4 = scmp.eq.s32.totalorder %s1570_s13, 7 }
  0x77   : > { %v391_v3 = vld [vmem:[#allocation8 + $0x28] sm:$0xff]  ;;  %v390_v6 = vld [vmem:[#allocation8 + $0x20] sm:$0xff]  ;;  %v393_v21 = vld [vmem:[#allocation8 + $0x38] sm:$0xff]  ;;  %s830_s29 = sshll.u32 %s1496_s26, 4  ;;  %s831_s29 = int_to_ptr.vmem [resolvable:$true] %s830_s29 }
  0x78   : > { %v1016_v5 = vpack.c.bf16 %v391_v3, %v387_v2  ;;  %v395_v7 = vld [vmem:[#allocation8 + $0x48] sm:$0xff]  ;;  %v1018_v9 = vpack.c.bf16 %v390_v6, %v386_v4  ;;  %v394_v11 = vld [vmem:[#allocation8 + $0x40] sm:$0xff]  ;;  %v1080_v23 = vpack.c.bf16 %v393_v21, %v389_v20  ;;  %v388_v24 = vld [vmem:[#allocation8 + $0x10] sm:$0xff]  ;;  %s1358_s19 = scalar_lea.vmem %s831_s29, 16  ;;  %s1364_s22 = scalar_lea.vmem %s831_s29, 32 }
  0x79   : > { %v399_v8 = vld [vmem:[#allocation8 + $0x68] sm:$0xff]  ;;  %v398_v12 = vld [vmem:[#allocation8 + $0x60] sm:$0xff]  ;;  %v392_v25 = vld [vmem:[#allocation8 + $0x30] sm:$0xff]  ;;  %p1359_p2 = scmp.ne.s32.totalorder %s831_s29, %s1358_s19  ;;  %p1365_p3 = scmp.lt.s32.totalorder %s831_s29, %s831_s29 }
  0x7a   : > { %v1020_v10 = vpack.c.bf16 %v399_v8, %v395_v7  ;;  %v403_v13 = vld [vmem:[#allocation8 + $0x88] sm:$0xff]  ;;  %1017 = vmatprep.subr.bf16.mxu0 %v1016_v5  ;;  %v1022_v15 = vpack.c.bf16 %v398_v12, %v394_v11  ;;  %v402_v16 = vld [vmem:[#allocation8 + $0x80] sm:$0xff]  ;;  %v1082_v26 = vpack.c.bf16 %v392_v25, %v388_v24  ;;  %1081 = vmatprep.subr.bf16.mxu1 %v1080_v23  ;;  %v397_v28 = vld [vmem:[#allocation8 + $0x58] sm:$0xff]  ;;  %p1366_p7 = scmp.lt.s32.totalorder %s1364_s22, %s1358_s19 }
  0x7b   : > { %v407_v14 = vld [vmem:[#allocation8 + $0xa8] sm:$0xff]  ;;  %1019 = vmatpush1.bf16.msra.mxu0 %v1018_v9  ;;  %v406_v17 = vld [vmem:[#allocation8 + $0xa0] sm:$0xff]  ;;  %v401_v29 = vld [vmem:[#allocation8 + $0x78] sm:$0xff]  ;;  %p1360_p9 = pnand %p1359_p2, %p1882_p4 }
  0x7c   : > { %1021 = vmatprep.subr.bf16.mxu0 %v1020_v10  ;;  %v1024_v18 = vpack.c.bf16 %v407_v14, %v403_v13  ;;  %v411_v19 = vld [vmem:[#allocation8 + $0xc8] sm:$0xff]  ;;  %v1026_v27 = vpack.c.bf16 %v406_v17, %v402_v16  ;;  %v396_v30 = vld [vmem:[#allocation8 + $0x50] sm:$0xff]  ;;  %v410_v32 = vld [vmem:[#allocation8 + $0xc0] sm:$0xff]  ;;  %1083 = vmatpush1.bf16.msra.mxu1 %v1082_v26  ;;  %v1084_v34 = vpack.c.bf16 %v401_v29, %v397_v28  ;;  %p1367_p10 = por %p1366_p7, %p1365_p3 }
  0x7d   : > { %v415_v22 = vld [vmem:[#allocation8 + $0xe8] sm:$0xff]  ;;  %v414_v33 = vld [vmem:[#allocation8 + $0xe0] sm:$0xff]  ;;  %v400_v35 = vld [vmem:[#allocation8 + $0x70] sm:$0xff]  ;;  %p1361_p12 = pneg %p1360_p9 }
  0x7e   : > { %v1028_v31 = vpack.c.bf16 %v415_v22, %v411_v19  ;;  %v419_v36 = vld [vmem:[#allocation8 + $0x108] sm:$0xff]  ;;  %v1086_v38 = vpack.c.bf16 %v400_v35, %v396_v30  ;;  %v405_v39 = vld [vmem:[#allocation8 + $0x98] sm:$0xff]  ;;  %1085 = vmatprep.subr.bf16.mxu1 %v1084_v34  ;;  %v404_v41 = vld [vmem:[#allocation8 + $0x90] sm:$0xff]  ;;  %v1030_v43 = vpack.c.bf16 %v414_v33, %v410_v32 }
  0x7f   : > { %1023 = vmatpush1.bf16.msra.mxu0 %v1022_v15  ;;  %v423_v37 = vld [vmem:[#allocation8 + $0x128] sm:$0xff]  ;;  %v409_v40 = vld [vmem:[#allocation8 + $0xb8] sm:$0xff]  ;;  %v408_v42 = vld [vmem:[#allocation8 + $0xb0] sm:$0xff]  ;;  %p1368_p13 = pnand %p1367_p10, %p1361_p12 }
  0x80   : > { %1025 = vmatprep.subr.bf16.mxu0 %v1024_v18  ;;  %v418_v44 = vld [vmem:[#allocation8 + $0x100] sm:$0xff]  ;;  %v1088_v46 = vpack.c.bf16 %v409_v40, %v405_v39  ;;  %v1032_v47 = vpack.c.bf16 %v423_v37, %v419_v36  ;;  %1087 = vmatpush1.bf16.msra.mxu1 %v1086_v38  ;;  %v427_v48 = vld [vmem:[#allocation8 + $0x148] sm:$0xff]  ;;  %v1090_v49 = vpack.c.bf16 %v408_v42, %v404_v41  ;;  %v413_v50 = vld [vmem:[#allocation8 + $0xd8] sm:$0xff] }
  0x81   : > { %v422_v45 = vld [vmem:[#allocation8 + $0x120] sm:$0xff]  ;;  %v417_v51 = vld [vmem:[#allocation8 + $0xf8] sm:$0xff]  ;;  %v431_v52 = vld [vmem:[#allocation8 + $0x168] sm:$0xff] }
  0x82   : > { %1089 = vmatprep.subr.bf16.mxu1 %v1088_v46  ;;  %v1092_v53 = vpack.c.bf16 %v417_v51, %v413_v50  ;;  %v412_v54 = vld [vmem:[#allocation8 + $0xd0] sm:$0xff]  ;;  %v1034_v56 = vpack.c.bf16 %v422_v45, %v418_v44  ;;  %v421_v57 = vld [vmem:[#allocation8 + $0x118] sm:$0xff]  ;;  %v1036_v59 = vpack.c.bf16 %v431_v52, %v427_v48  ;;  %v426_v60 = vld [vmem:[#allocation8 + $0x140] sm:$0xff] }
  0x83   : > { %1027 = vmatpush1.bf16.msra.mxu0 %v1026_v27  ;;  %v416_v55 = vld [vmem:[#allocation8 + $0xf0] sm:$0xff]  ;;  %v425_v58 = vld [vmem:[#allocation8 + $0x138] sm:$0xff]  ;;  %v430_v61 = vld [vmem:[#allocation8 + $0x160] sm:$0xff] }
  0x84   : > { %1029 = vmatprep.subr.bf16.mxu0 %v1028_v31  ;;  %1091 = vmatpush1.bf16.msra.mxu1 %v1090_v49  ;;  %v435_v62 = vld [vmem:[#allocation8 + $0x188] sm:$0xff]  ;;  %v1094_v63 = vpack.c.bf16 %v416_v55, %v412_v54  ;;  %v1096_v1 = vpack.c.bf16 %v425_v58, %v421_v57  ;;  %v420_v2 = vld [vmem:[#allocation8 + $0x110] sm:$0xff]  ;;  %v429_v4 = vld [vmem:[#allocation8 + $0x158] sm:$0xff]  ;;  %v1038_v6 = vpack.c.bf16 %v430_v61, %v426_v60 }
  0x85   : > { %v439_v0 = vld [vmem:[#allocation8 + $0x1a8] sm:$0xff]  ;;  %1093 = vmatprep.subr.bf16.mxu1 %v1092_v53  ;;  %v424_v3 = vld [vmem:[#allocation8 + $0x130] sm:$0xff]  ;;  %v433_v5 = vld [vmem:[#allocation8 + $0x178] sm:$0xff] }
  0x86   : > { %v1040_v7 = vpack.c.bf16 %v439_v0, %v435_v62  ;;  %v434_v8 = vld [vmem:[#allocation8 + $0x180] sm:$0xff]  ;;  %v443_v10 = vld [vmem:[#allocation8 + $0x1c8] sm:$0xff]  ;;  %v1098_v11 = vpack.c.bf16 %v424_v3, %v420_v2  ;;  %v1100_v13 = vpack.c.bf16 %v433_v5, %v429_v4  ;;  %v428_v14 = vld [vmem:[#allocation8 + $0x150] sm:$0xff] }
  0x87   : > { %1031 = vmatpush1.bf16.msra.mxu0 %v1030_v43  ;;  %v438_v9 = vld [vmem:[#allocation8 + $0x1a0] sm:$0xff]  ;;  %v447_v12 = vld [vmem:[#allocation8 + $0x1e8] sm:$0xff]  ;;  %v432_v15 = vld [vmem:[#allocation8 + $0x170] sm:$0xff]  ;;  %v378_v43 = vlaneseq }
  0x88   : > { %1033 = vmatprep.subr.bf16.mxu0 %v1032_v47  ;;  %1095 = vmatpush1.bf16.msra.mxu1 %v1094_v63  ;;  %v437_v16 = vld [vmem:[#allocation8 + $0x198] sm:$0xff]  ;;  %v1042_v18 = vpack.c.bf16 %v438_v9, %v434_v8  ;;  %v1044_v19 = vpack.c.bf16 %v447_v12, %v443_v10  ;;  %v442_v20 = vld [vmem:[#allocation8 + $0x1c0] sm:$0xff]  ;;  %v451_v22 = vld [vmem:[#allocation8 + $0x208] sm:$0xff]  ;;  %v1102_v23 = vpack.c.bf16 %v432_v15, %v428_v14 }
  0x89   : > { %1097 = vmatprep.subr.bf16.mxu1 %v1096_v1  ;;  %v441_v17 = vld [vmem:[#allocation8 + $0x1b8] sm:$0xff]  ;;  %v446_v21 = vld [vmem:[#allocation8 + $0x1e0] sm:$0xff]  ;;  %v455_v24 = vld [vmem:[#allocation8 + $0x228] sm:$0xff]  ;;  %vm1732_vm0 = vcmp.lt.s32.totalorder %v378_v43, 128 }
  0x8a   : > { %v1104_v25 = vpack.c.bf16 %v441_v17, %v437_v16  ;;  %v436_v26 = vld [vmem:[#allocation8 + $0x190] sm:$0xff]  ;;  %v445_v28 = vld [vmem:[#allocation8 + $0x1d8] sm:$0xff]  ;;  %v1046_v30 = vpack.c.bf16 %v446_v21, %v442_v20  ;;  %v1048_v31 = vpack.c.bf16 %v455_v24, %v451_v22  ;;  %v450_v32 = vld [vmem:[#allocation8 + $0x200] sm:$0xff] }
  0x8b   : > { %1035 = vmatpush1.bf16.msra.mxu0 %v1034_v56  ;;  %v440_v27 = vld [vmem:[#allocation8 + $0x1b0] sm:$0xff]  ;;  %v449_v29 = vld [vmem:[#allocation8 + $0x1f8] sm:$0xff]  ;;  %v454_v33 = vld [vmem:[#allocation8 + $0x220] sm:$0xff] }
  0x8c   : > { %1037 = vmatprep.subr.bf16.mxu0 %v1036_v59  ;;  %1099 = vmatpush1.bf16.msra.mxu1 %v1098_v11  ;;  %v459_v34 = vld [vmem:[#allocation8 + $0x248] sm:$0xff]  ;;  %v1106_v35 = vpack.c.bf16 %v440_v27, %v436_v26  ;;  %v1108_v37 = vpack.c.bf16 %v449_v29, %v445_v28  ;;  %v444_v38 = vld [vmem:[#allocation8 + $0x1d0] sm:$0xff]  ;;  %v453_v40 = vld [vmem:[#allocation8 + $0x218] sm:$0xff]  ;;  %v1050_v42 = vpack.c.bf16 %v454_v33, %v450_v32 }
  0x8d   : > { %1101 = vmatprep.subr.bf16.mxu1 %v1100_v13  ;;  %v463_v36 = vld [vmem:[#allocation8 + $0x268] sm:$0xff]  ;;  %v448_v39 = vld [vmem:[#allocation8 + $0x1f0] sm:$0xff]  ;;  %v457_v41 = vld [vmem:[#allocation8 + $0x238] sm:$0xff] }
  0x8e   : > { %v1052_v44 = vpack.c.bf16 %v463_v36, %v459_v34  ;;  %v458_v45 = vld [vmem:[#allocation8 + $0x240] sm:$0xff]  ;;  %v467_v47 = vld [vmem:[#allocation8 + $0x288] sm:$0xff]  ;;  %v1110_v48 = vpack.c.bf16 %v448_v39, %v444_v38  ;;  %v1112_v50 = vpack.c.bf16 %v457_v41, %v453_v40  ;;  %v452_v51 = vld [vmem:[#allocation8 + $0x210] sm:$0xff] }
  0x8f   : > { %1039 = vmatpush1.bf16.msra.mxu0 %v1038_v6  ;;  %v462_v46 = vld [vmem:[#allocation8 + $0x260] sm:$0xff]  ;;  %v471_v49 = vld [vmem:[#allocation8 + $0x2a8] sm:$0xff]  ;;  %v456_v52 = vld [vmem:[#allocation8 + $0x230] sm:$0xff]  ;;  %v1742_v6 = vshrl.u32 %v378_v43, 7 }
  0x90   : > { %1041 = vmatprep.subr.bf16.mxu0 %v1040_v7  ;;  %1103 = vmatpush1.bf16.msra.mxu1 %v1102_v23  ;;  %v461_v53 = vld [vmem:[#allocation8 + $0x258] sm:$0xff]  ;;  %v1054_v55 = vpack.c.bf16 %v462_v46, %v458_v45  ;;  %v466_v56 = vld [vmem:[#allocation8 + $0x280] sm:$0xff]  ;;  %v1056_v59 = vpack.c.bf16 %v471_v49, %v467_v47  ;;  %v475_v60 = vld [vmem:[#allocation8 + $0x2c8] sm:$0xff]  ;;  %v1114_v62 = vpack.c.bf16 %v456_v52, %v452_v51 }
  0x91   : > { %1105 = vmatprep.subr.bf16.mxu1 %v1104_v25  ;;  %v465_v54 = vld [vmem:[#allocation8 + $0x278] sm:$0xff]  ;;  %v470_v57 = vld [vmem:[#allocation8 + $0x2a0] sm:$0xff]  ;;  %v479_v61 = vld [vmem:[#allocation8 + $0x2e8] sm:$0xff] }
  0x92   : > { %v460_v63 = vld [vmem:[#allocation8 + $0x250] sm:$0xff]  ;;  %v1116_v0 = vpack.c.bf16 %v465_v54, %v461_v53  ;;  %v377_v2 = vld [vmem:[%s328_s16] sm:$0x1]  ;;  %v383_v3 = vld [vmem:[#allocation3] sm:$0x1]  ;;  %v1058_v7 = vpack.c.bf16 %v470_v57, %v466_v56  ;;  %v1060_v8 = vpack.c.bf16 %v479_v61, %v475_v60 }
  0x93   : > { %1043 = vmatpush1.bf16.msra.mxu0 %v1042_v18  ;;  %v464_v1 = vld [vmem:[#allocation8 + $0x270] sm:$0xff]  ;;  %v469_v4 = vld [vmem:[#allocation8 + $0x298] sm:$0xff]  ;;  %382 = vst.msk [vmem:[#allocation2] sm:$0x1] %vm1732_vm0, %v377_v2  ;;  %384 = vst.msk [vmem:[#allocation2 + $0x1] sm:$0x1] %vm1732_vm0, %v383_v3 }
  0x94   : > { %1045 = vmatprep.subr.bf16.mxu0 %v1044_v19  ;;  %1107 = vmatpush1.bf16.msra.mxu1 %v1106_v35  ;;  %v473_v5 = vld [vmem:[#allocation8 + $0x2b8] sm:$0xff]  ;;  %v474_v9 = vld [vmem:[#allocation8 + $0x2c0] sm:$0xff]  ;;  %v483_v11 = vld [vmem:[#allocation8 + $0x308] sm:$0xff]  ;;  %v1118_v12 = vpack.c.bf16 %v464_v1, %v460_v63  ;;  %v522_v19 = vsub.s32 1, %v1742_v6  ;;  %v518_v2 = vsub.s32 0, %v1742_v6 }
  0x95   : > { %1109 = vmatprep.subr.bf16.mxu1 %v1108_v37  ;;  %v478_v10 = vld [vmem:[#allocation8 + $0x2e0] sm:$0xff]  ;;  %v487_v13 = vld [vmem:[#allocation8 + $0x328] sm:$0xff]  ;;  %v1120_v14 = vpack.c.bf16 %v473_v5, %v469_v4  ;;  %v468_v15 = vld [vmem:[#allocation8 + $0x290] sm:$0xff] }
  0x96   : > { %v472_v16 = vld [vmem:[#allocation8 + $0x2b0] sm:$0xff]  ;;  %v477_v17 = vld [vmem:[#allocation8 + $0x2d8] sm:$0xff]  ;;  %v1062_v20 = vpack.c.bf16 %v478_v10, %v474_v9  ;;  %v482_v21 = vld [vmem:[#allocation8 + $0x300] sm:$0xff]  ;;  %v1064_v22 = vpack.c.bf16 %v487_v13, %v483_v11 }
  0x97   : > { %1047 = vmatpush1.bf16.msra.mxu0 %v1046_v30  ;;  %v481_v18 = vld [vmem:[#allocation8 + $0x2f8] sm:$0xff]  ;;  %v486_v23 = vld [vmem:[#allocation8 + $0x320] sm:$0xff]  ;;  %v491_v24 = vld [vmem:[#allocation8 + $0x348] sm:$0xff]  ;;  %v1122_v26 = vpack.c.bf16 %v472_v16, %v468_v15  ;;  %v1493_v16 = vmov 0.0|0.0  }
  0x98   : > { %1049 = vmatprep.subr.bf16.mxu0 %v1048_v31  ;;  %1111 = vmatpush1.bf16.msra.mxu1 %v1110_v48  ;;  %v495_v25 = vld [vmem:[#allocation8 + $0x368] sm:$0xff]  ;;  %v1124_v27 = vpack.c.bf16 %v481_v18, %v477_v17  ;;  %v476_v28 = vld [vmem:[#allocation8 + $0x2d0] sm:$0xff]  ;;  %v485_v31 = vld [vmem:[#allocation8 + $0x318] sm:$0xff]  ;;  %v1066_v34 = vpack.c.bf16 %v486_v23, %v482_v21 }
  0x99   : > { %1113 = vmatprep.subr.bf16.mxu1 %v1112_v50  ;;  %v480_v29 = vld [vmem:[#allocation8 + $0x2f0] sm:$0xff]  ;;  %v489_v32 = vld [vmem:[#allocation8 + $0x338] sm:$0xff]  ;;  %v1068_v35 = vpack.c.bf16 %v495_v25, %v491_v24  ;;  %v490_v36 = vld [vmem:[#allocation8 + $0x340] sm:$0xff] }
  0x9a   : > { %v385_v30 = vld [vmem:[#allocation2] sm:$0x3]  ;;  %v494_v37 = vld [vmem:[#allocation8 + $0x360] sm:$0xff]  ;;  %v499_v38 = vld [vmem:[#allocation8 + $0x388] sm:$0xff]  ;;  %v1126_v39 = vpack.c.bf16 %v480_v29, %v476_v28  ;;  %v1128_v41 = vpack.c.bf16 %v489_v32, %v485_v31 }
  0x9b   : > { %1051 = vmatpush1.bf16.msra.mxu0 %v1050_v42  ;;  %v523_v33 = vrot.slane %v385_v30, %v522_v19  ;;  %v503_v40 = vld [vmem:[#allocation8 + $0x3a8] sm:$0xff]  ;;  %v484_v42 = vld [vmem:[#allocation8 + $0x310] sm:$0xff]  ;;  %v497_v45 = vld [vmem:[#allocation8 + $0x378] sm:$0xff]  ;;  %v1070_v46 = vpack.c.bf16 %v494_v37, %v490_v36  ;;  %v519_v11 = vrot.slane %v385_v30, %v518_v2 }
  0x9c   : > { %1053 = vmatprep.subr.bf16.mxu0 %v1052_v44  ;;  %1115 = vmatpush1.bf16.msra.mxu1 %v1114_v62  ;;  %v488_v43 = vld [vmem:[#allocation8 + $0x330] sm:$0xff]  ;;  %v493_v44 = vld [vmem:[#allocation8 + $0x358] sm:$0xff]  ;;  %v1072_v47 = vpack.c.bf16 %v503_v40, %v499_v38  ;;  %v498_v48 = vld [vmem:[#allocation8 + $0x380] sm:$0xff] }
  0x9d   : > { %1117 = vmatprep.subr.bf16.mxu1 %v1116_v0  ;;  %611 = vmatprep.mubr.f32.mxu0 %v523_v33  ;;  %v502_v49 = vld [vmem:[#allocation8 + $0x3a0] sm:$0xff]  ;;  %v507_v50 = vld [vmem:[#allocation8 + $0x3c8] sm:$0xff]  ;;  %v1130_v51 = vpack.c.bf16 %v488_v43, %v484_v42  ;;  %v1132_v53 = vpack.c.bf16 %v497_v45, %v493_v44  ;;  %v492_v54 = vld [vmem:[#allocation8 + $0x350] sm:$0xff]  ;;  %v541_v43 = vsub.s32 3, %v1742_v6 }
  0x9e   : > { %682 = vmatprep.mubr.f32.mxu1 %v523_v33  ;;  %v511_v52 = vld [vmem:[#allocation8 + $0x3e8] sm:$0xff]  ;;  %v501_v56 = vld [vmem:[#allocation8 + $0x398] sm:$0xff]  ;;  %v1074_v58 = vpack.c.bf16 %v502_v49, %v498_v48  ;;  %v506_v60 = vld [vmem:[#allocation8 + $0x3c0] sm:$0xff] }
  0x9f   : > { %1055 = vmatpush1.bf16.msra.mxu0 %v1054_v55  ;;  %v496_v55 = vld [vmem:[#allocation8 + $0x370] sm:$0xff]  ;;  %v505_v57 = vld [vmem:[#allocation8 + $0x3b8] sm:$0xff]  ;;  %v510_v61 = vld [vmem:[#allocation8 + $0x3e0] sm:$0xff] }
  0xa0   : > { %1057 = vmatprep.subr.bf16.mxu0 %v1056_v59  ;;  %1119 = vmatpush1.bf16.msra.mxu1 %v1118_v12  ;;  %v1076_v59 = vpack.c.bf16 %v511_v52, %v507_v50  ;;  %v1134_v62 = vpack.c.bf16 %v496_v55, %v492_v54  ;;  %v1136_v63 = vpack.c.bf16 %v505_v57, %v501_v56  ;;  %v500_v0 = vld [vmem:[#allocation8 + $0x390] sm:$0xff]  ;;  %v509_v3 = vld [vmem:[#allocation8 + $0x3d8] sm:$0xff]  ;;  %v716_v13 = vld [vmem:[#allocation10] sm:$0xff] }
  0xa1   : > { %1121 = vmatprep.subr.bf16.mxu1 %v1120_v14  ;;  %v504_v1 = vld [vmem:[#allocation8 + $0x3b0] sm:$0xff]  ;;  %v513_v4 = vld [vmem:[#allocation8 + $0x3f8] sm:$0xff]  ;;  %v1078_v5 = vpack.c.bf16 %v510_v61, %v506_v60  ;;  %v717_v14 = vld [vmem:[#allocation10 + $0x8] sm:$0xff] }
  0xa2   : > { %v508_v9 = vld [vmem:[#allocation8 + $0x3d0] sm:$0xff]  ;;  %v1145_v15 = vpack.c.bf16 %v717_v14, %v716_v13  ;;  %v719_v18 = vld [vmem:[#allocation10 + $0x18] sm:$0xff]  ;;  %v720_v21 = vld [vmem:[#allocation10 + $0x20] sm:$0xff] }
  0xa3   : > { %1059 = vmatpush1.bf16.msra.mxu0 %v1058_v7  ;;  %v1138_v7 = vpack.c.bf16 %v504_v1, %v500_v0  ;;  %v512_v10 = vld [vmem:[#allocation8 + $0x3f0] sm:$0xff]  ;;  %v723_v25 = vld [vmem:[#allocation10 + $0x38] sm:$0xff]  ;;  %v725_v28 = vld [vmem:[#allocation10 + $0x48] sm:$0xff] }
  0xa4   : > { %1061 = vmatprep.subr.bf16.mxu0 %v1060_v8  ;;  %1123 = vmatpush1.bf16.msra.mxu1 %v1122_v26  ;;  %v1140_v8 = vpack.c.bf16 %v513_v4, %v509_v3  ;;  %v1142_v12 = vpack.c.bf16 %v512_v10, %v508_v9  ;;  %v718_v17 = vld [vmem:[#allocation10 + $0x10] sm:$0xff]  ;;  %v727_v31 = vld [vmem:[#allocation10 + $0x58] sm:$0xff]  ;;  %v728_v33 = vld [vmem:[#allocation10 + $0x60] sm:$0xff] }
  0xa5   : > { %1125 = vmatprep.subr.bf16.mxu1 %v1124_v27  ;;  %v722_v24 = vld [vmem:[#allocation10 + $0x30] sm:$0xff]  ;;  %v724_v27 = vld [vmem:[#allocation10 + $0x40] sm:$0xff]  ;;  %v731_v38 = vld [vmem:[#allocation10 + $0x78] sm:$0xff] }
  0xa6   : > { %v1154_v26 = vpack.c.bf16 %v723_v25, %v722_v24  ;;  %v1157_v29 = vpack.c.bf16 %v725_v28, %v724_v27  ;;  %v726_v30 = vld [vmem:[#allocation10 + $0x50] sm:$0xff]  ;;  %v514_v40 = vld [vmem:[%s1857_s4] sm:$0xf] }
  0xa7   : > { %1063 = vmatpush1.bf16.msra.mxu0 %v1062_v20  ;;  %v1148_v20 = vpack.c.bf16 %v719_v18, %v718_v17  ;;  %v1160_v32 = vpack.c.bf16 %v727_v31, %v726_v30  ;;  %v730_v37 = vld [vmem:[#allocation10 + $0x70] sm:$0xff]  ;;  %v534_v42 = vrot.slane %v514_v40, %v522_v19  ;;  %v542_v49 = vrot.slane %v514_v40, %v541_v43 }
  0xa8   : > { %1065 = vmatprep.subr.bf16.mxu0 %v1064_v22  ;;  %1127 = vmatpush1.bf16.msra.mxu1 %v1126_v39  ;;  %v721_v22 = vld [vmem:[#allocation10 + $0x28] sm:$0xff]  ;;  %v1166_v39 = vpack.c.bf16 %v731_v38, %v730_v37 }
  0xa9   : > { %1129 = vmatprep.subr.bf16.mxu1 %v1128_v41  ;;  %v1151_v23 = vpack.c.bf16 %v721_v22, %v720_v21  ;;  %v530_v41 = vrot.slane %v514_v40, %v518_v2 }
  0xab   : > { %1067 = vmatpush1.bf16.msra.mxu0 %v1066_v34  ;;  %v729_v34 = vld [vmem:[#allocation10 + $0x68] sm:$0xff] }
  0xac   : > { %1069 = vmatprep.subr.bf16.mxu0 %v1068_v35  ;;  %1131 = vmatpush1.bf16.msra.mxu1 %v1130_v51  ;;  %v1495_v35 = vmov 0.0   ;;  %v1163_v36 = vpack.c.bf16 %v729_v34, %v728_v33  ;;  %v537_v51 = vsub.s32 2, %v1742_v6 }
  0xad   : > { %1133 = vmatprep.subr.bf16.mxu1 %v1132_v53 }
  0xae   : > { %v538_v55 = vrot.slane %v514_v40, %v537_v51 }
  0xaf   : > { %1071 = vmatpush1.bf16.msra.mxu0 %v1070_v46 }
  0xb0   : > { %1073 = vmatprep.subr.bf16.mxu0 %v1072_v47  ;;  %1135 = vmatpush1.bf16.msra.mxu1 %v1134_v62 }
  0xb1   : > { %1137 = vmatprep.subr.bf16.mxu1 %v1136_v63  ;;  %v708_v63 = vld [vmem:[#allocation4] sm:$0x1] }
  0xb3   : > { %1075 = vmatpush1.bf16.msra.mxu0 %v1074_v58 }
  0xb4   : > { %1077 = vmatprep.subr.bf16.mxu0 %v1076_v59  ;;  %1139 = vmatpush1.bf16.msra.mxu1 %v1138_v7 }
  0xb5   : > { %1141 = vmatprep.subr.bf16.mxu1 %v1140_v8 }
  0xb7   : > { %1079 = vmatpush1.bf16.msra.mxu0 %v1078_v5 }
  0xb8   : > { %1143 = vmatpush1.bf16.msra.mxu1 %v1142_v12  ;;  %1144 = vmatprep.subr.bf16.mxu0 %v1493_v16 }
  0xba   : > { %612 = vmatmul.mubr.f32.vlgmr.msra.gmra.mrb[0].mxu0 %v519_v11 }
  0xbb   : > { %683 = vmatmul.mubr.f32.vlgmr.msra.gmra.mrb[0].mxu1 %v519_v11  ;;  %1146 = vmatpush3.bf16.msra.mxu0 %v1145_v15 }
  0xbc   : > { %1147 = vmatprep.subr.bf16.mxu0 %v1493_v16  ;;  %1013 = vmatprep.mubr.msk.f32.mxu0 %vm1494_vm1, %v1495_v35 }
  0xbf   : > { %1149 = vmatpush3.bf16.msra.mxu0 %v1148_v20 }
  0xc0   : > { %1150 = vmatprep.subr.bf16.mxu0 %v1493_v16 }
  0xc3   : > { %1152 = vmatpush3.bf16.msra.mxu0 %v1151_v23 }
  0xc4   : > { %1153 = vmatprep.subr.bf16.mxu0 %v1493_v16 }
  0xc7   : > { %1155 = vmatpush3.bf16.msra.mxu0 %v1154_v26 }
  0xc8   : > { %1156 = vmatprep.subr.bf16.mxu0 %v1493_v16 }
  0xcb   : > { %1158 = vmatpush3.bf16.msra.mxu0 %v1157_v29 }
  0xcc   : > { %1159 = vmatprep.subr.bf16.mxu0 %v1493_v16 }
  0xcf   : > { %1161 = vmatpush3.bf16.msra.mxu0 %v1160_v32 }
  0xd0   : > { %1162 = vmatprep.subr.bf16.mxu0 %v1493_v16 }
  0xd3   : > { %1164 = vmatpush3.bf16.msra.mxu0 %v1163_v36 }
  0xd4   : > { %1165 = vmatprep.subr.bf16.mxu0 %v1493_v16 }
  0xd7   : > { %1167 = vmatpush3.bf16.msra.mxu0 %v1166_v39 }
 0x18d   : > { %v613_v44 = vpop.f32.mrb[0].mxu0 }
 0x18e   : > { %v614_v45 = vadd.f32 %v613_v44, %v530_v41  ;;  %v615_v46 = vpop.f32.mrb[1].mxu0  ;;  %v684_v52 = vpop.f32.mrb[0].mxu1 }
 0x18f   : > { %v616_v47 = vadd.f32 %v615_v46, %v534_v42  ;;  %v686_v53 = vpop.f32.mrb[1].mxu1  ;;  %v685_v57 = vadd.f32 %v684_v52, %v538_v55 }
 0x190   : > { %v954_v48 = vmul.f32 -1.442695, %v614_v45  ;;  %v687_v54 = vadd.f32 %v686_v53, %v542_v49 }
 0x191   : > { %v955_v50 = vmul.f32 -1.442695, %v616_v47 }
 0x192   : > { %1256 = vpow2.f32 %v954_v48  ;;  %v956_v56 = vmul.f32 -1.442695, %v687_v54 }
 0x193   : > { %1258 = vpow2.f32 %v955_v50 }
 0x194   : > { %1260 = vpow2.f32 %v956_v56 }
 0x195   : > { %1262 = vtanh.f32 %v685_v57 }
 0x19c   : > { %v1257_v19 = vpop.eup %1256 }
 0x19d   : > { %v1259_v58 = vpop.eup %1258  ;;  %v692_v59 = vadd.f32 1.0, %v1257_v19 }
 0x19e   : > { %v698_v60 = vadd.f32 1.0, %v1259_v58  ;;  %v1261_v61 = vpop.eup %1260 }
 0x19f   : > { %1264 = vrcp.f32 %v692_v59  ;;  %v1263_v62 = vpop.eup %1262  ;;  %v705_v0 = vadd.f32 1.0, %v1261_v61 }
 0x1a0   : > { %1266 = vrcp.f32 %v698_v60 }
 0x1a1   : > { %1268 = vrcp.f32 %v705_v0 }
 0x1a9   : > { %v1265_v6 = vpop.eup %1264 }
 0x1aa   : > { %v1267_v1 = vpop.eup %1266  ;;  %v710_v2 = vmul.f32 %v1265_v6, %v1263_v62 }
 0x1ab   : > { %v709_v3 = vmul.f32 %v1267_v1, %v708_v63  ;;  %v1269_v5 = vpop.eup %1268 }
 0x1ad   : > { %v711_v4 = vadd.f32 %v710_v2, %v709_v3 }
 0x1af   : > { %714 = vst [vmem:[#allocation4] sm:$0x1] %v711_v4  ;;  %805 = vst [vmem:[#allocation14] sm:$0x1] %v711_v4  ;;  %1270 = vtanh.f32 %v711_v4 }
 0x1b9   : > { %v1271_v7 = vpop.eup %1270 }
 0x1ba   : > { %v713_v8 = vmul.f32 %v1271_v7, %v1269_v5 }
 0x1bc   : > { %715 = vst [vmem:[#allocation3] sm:$0x1] %v713_v8  ;;  %1014 = vmatmul.mubr.f32.vlgmr.msra.gmra.mrb[2].mxu0 %v713_v8  ;;  %804 = vst [vmem:[#allocation12] sm:$0x1] %v713_v8 }
 0x1bd   : > { %1371 = shalt.err (!%p1368_p13)
}
 0x1be   : > { %s1372_s18 = scalar_lea.hbm %s1861_s8, 16  ;;  %p1883_p0 = pmov %p1882_p4 }
 0x1bf   : > { %p1373_p5 = scmp.ne.s32.totalorder %s1861_s8, %s1372_s18  ;;  %p1378_p1 = scmp.lt.u32.totalorder %s1372_s18, %s1861_s8 }
 0x1c1   : > { %p1374_p8 = pnand %p1373_p5, %p1883_p0 }
 0x1c3   : > { %p1375_p11 = pneg %p1374_p8 }
 0x1c5   : > { %p1380_p2 = pnand %p1378_p1, %p1375_p11 }
 0x1c7   : > { %1383 = shalt.err (!%p1380_p2)
}
 0x1c8   : > { %p1884_p4 = pmov %p1883_p0  ;;  %s1497_s22 = smov [#allocation14]  }
 0x1c9   : > { %s841_s16 = sshll.u32 %s1497_s22, 4  ;;  %p1885_p12 = pmov %p1883_p0  ;;  %s842_s16 = int_to_ptr.vmem [resolvable:$true] %s841_s16 }
 0x1ca   : > { %1180 = dma.vmem_to_hbm [thread:$0]  (%p1884_p4), %s831_s29, 16, %s1861_s8, [#allocation13]  }
 0x1cb   : > { %s1384_s14 = scalar_lea.vmem %s842_s16, 16  ;;  %s1390_s21 = scalar_lea.vmem %s842_s16, 32 }
 0x1cc   : > { %p1385_p9 = scmp.ne.s32.totalorder %s842_s16, %s1384_s14  ;;  %p1391_p10 = scmp.lt.s32.totalorder %s842_s16, %s842_s16 }
 0x1cd   : > { %p1392_p13 = scmp.lt.s32.totalorder %s1390_s21, %s1384_s14 }
 0x1ce   : > { %p1386_p3 = pnand %p1385_p9, %p1885_p12 }
 0x1cf   : > { %p1393_p5 = por %p1392_p13, %p1391_p10 }
 0x1d0   : > { %p1387_p7 = pneg %p1386_p3 }
 0x1d2   : > { %p1394_p0 = pnand %p1393_p5, %p1387_p7 }
 0x1d4   : > { %1397 = shalt.err (!%p1394_p0)
}
 0x1d5   : > { %s1398_s15 = scalar_lea.hbm %s1862_s9, 16  ;;  %p1886_p11 = pmov %p1884_p4 }
 0x1d6   : > { %p1399_p8 = scmp.ne.s32.totalorder %s1862_s9, %s1398_s15  ;;  %p1404_p4 = scmp.lt.u32.totalorder %s1398_s15, %s1862_s9 }
 0x1d8   : > { %p1400_p1 = pnand %p1399_p8, %p1886_p11 }
 0x1da   : > { %p1401_p2 = pneg %p1400_p1 }
 0x1dc   : > { %p1406_p9 = pnand %p1404_p4, %p1401_p2 }
 0x1de   : > { %1409 = shalt.err (!%p1406_p9)
}
 0x1df   : > { %p1887_p12 = pmov %p1886_p11  ;;  %v732_v9 = vld [vmem:[%s1859_s6] sm:$0x1]  ;;  %s957_s23 = sshll.u32 %s1570_s13, 4 }
 0x1e0   : > { %s819_s15 = sshll.u32 %s364_s17, 4  ;;  %s1804_s26 = scalar_lea.hbm %s1860_s7, %s957_s23  ;;  %s1806_s15 = int_to_ptr.vmem [resolvable:$true] %s819_s15 }
 0x1e1   : > { %1182 = dma.vmem_to_hbm [thread:$0]  (%p1887_p12), %s842_s16, 16, %s1862_s9, [#allocation13]  }
 0x1e2   : > { %s807_s16 = scalar_lea.sflag [#allocation7], %s1711_s25  ;;  %s1410_s19 = scalar_lea.vmem %s1806_s15, 16 }
 0x1e3   : > { %p1411_p3 = scmp.ne.s32.totalorder %s1806_s15, %s1410_s19  ;;  %s1498_s22 = smov [#allocation11]  }
 0x1e4   : > { %s1414_s14 = sshll.u32 %s1498_s22, 4  ;;  %s1415_s14 = int_to_ptr.vmem [resolvable:$false] %s1414_s14 }
 0x1e5   : > { %p1412_p7 = pnand %p1411_p3, %p1665_p6  ;;  %s1416_s21 = scalar_lea.vmem %s1415_s14, 32 }
 0x1e6   : > { %p1417_p13 = scmp.lt.s32.totalorder %s1806_s15, %s1415_s14  ;;  %p1418_p5 = scmp.lt.s32.totalorder %s1416_s21, %s1410_s19 }
 0x1e7   : > { %p1413_p10 = pneg %p1412_p7 }
 0x1e8   : > { %p1419_p0 = por %p1418_p5, %p1417_p13 }
 0x1ea   : > { %p1420_p8 = pnand %p1419_p0, %p1413_p10 }
 0x28f   : > { %v799_v10 = vpop.f32.mrb[2].mxu0 }
 0x290   : > { %v800_v11 = vadd.f32 %v799_v10, %v732_v9  ;;  %v1015_v12 = vpop.f32.mrb[3].mxu0 }
 0x292   : > { %803 = vst [vmem:[%s364_s17] sm:$0x1] %v800_v11 }
 0x293   : > { %1423 = shalt.err (!%p1420_p8)
}
 0x294   : > { %s1424_s25 = scalar_lea.hbm %s1804_s26, 16  ;;  %s1428_s23 = scalar_lea.hbm %s1860_s7, 128 }
 0x295   : > { %p1425_p11 = scmp.ne.s32.totalorder %s1804_s26, %s1424_s25  ;;  %p1429_p4 = scmp.lt.u32.totalorder %s1804_s26, %s1860_s7 }
 0x296   : > { %p1430_p9 = scmp.lt.u32.totalorder %s1428_s23, %s1424_s25  ;;  %p1432_p3 = scmp.lt.u32.totalorder %s1424_s25, %s1804_s26 }
 0x297   : > { %p1426_p1 = pnand %p1425_p11, %p1665_p6 }
 0x298   : > { %p1431_p12 = por %p1430_p9, %p1429_p4 }
 0x299   : > { %p1427_p2 = pneg %p1426_p1 }
 0x29a   : > { %p1433_p7 = por %p1432_p3, %p1431_p12 }
 0x29c   : > { %p1434_p10 = pnand %p1433_p7, %p1427_p2 }
 0x29e   : > { %1437 = shalt.err (!%p1434_p10)
}
 0x29f   : > { %1178 = dma.vmem_to_hbm [thread:$0]  (%p1665_p6), %s1806_s15, 16, %s1804_s26, %s807_s16  }
 0x2a0   : > { %p1888_p13 = scmp.eq.s32.totalorder %s1570_s13, 7 }
 0x2a2   : > { %1463 = dma.done.wait (%p1888_p13), [#allocation13], 32   ;;  %p1889_p5 = pmov %p1888_p13 }
 0x2a4   : > { %1465 = vsyncadd (%p1889_p5), [#allocation13], 4294967264 }
 0x2a5 PF: > { %s1890_s19 = sld [smem:[#allocation19_spill]]  ;;  %p1212_p0 = scmp.ge.s32.totalorder %s1484_s12, 2 }
 0x2a6   : > { %s861_s22 = sand.u32 1, %s1472_s30  }
 0x2a7   : > { %s862_s14 = scalar_lea.sflag [#allocation7], %s861_s22 }
 0x2ab   : > { %p1891_p8 = scmp.ne.s32.totalorder %s1890_s19, 0 }
 0x2ad   : > { %p1200_p11 = pnand %p1212_p0, %p1891_p8 }
 0x2af   : > { %1467 = dma.done.wait (!%p1200_p11), %s862_s14, 16  }
 0x2b0   : > { %1469 = vsyncadd (!%p1200_p11), %s862_s14, 4294967280  ;;  %p25_p6 = scmp.ge.s32.totalorder %s1652_s24, 10   ;;  %s1892_s30 = smov %s1476_s10 }
 0x2b1   : > { %s1893_s10 = smov %s1480_s11  ;;  %s1894_s11 = smov %s1661_s27 }
 0x2b2   : > { %s1895_s12 = smov %s1652_s24  ;;  %27 = sbr.rel (!%p25_p6) target bundleno = 7 (0x7), region = 121 }
 0x2b9   :  { %866 = vsyncpa [#allocation6], 1 }
 0x2ba   :  { %868 = vsyncpa [#allocation6 + $0x1], 1 }
 0x2bb   :  { %869 = vsyncpa [#allocation9], 1 }
 0x2bc   :  { %870 = vsyncpa [#allocation7], 1 }
 0x2bd   :  { %872 = vsyncpa [#allocation7 + $0x1], 1 }
 0x2be   :  { %873 = vsyncpa [#allocation13], 1 }

</bundles_post_ra>
